<compile_context>
chip_gen: v6e
topology: v6e:2x2x1
jax: 0.10.0
libtpu: 0.0.40
codegen_flags: <defaults>
</compile_context>

<pallas_src>
import functools
import math

import jax
import jax.numpy as jnp
from jax.experimental import pallas as pl
from jax.experimental.pallas import tpu as pltpu


# ----------------------------------------------------------------------------
# Helpers
# ----------------------------------------------------------------------------

def _round_up(v, m):
    return ((v + m - 1) // m) * m


def _tpu_vmem_capacity_bytes():
    try:
        return int(pltpu.get_tpu_info().vmem_capacity_bytes)
    except Exception:
        return 64 * 1024 * 1024   # conservative: v7x per-TensorCore VMEM


# ----------------------------------------------------------------------------
# Kernels
# ----------------------------------------------------------------------------

def _noisy_linear_train_kernel(x_ref, wmu_ref, wsig_ref, weps_ref,
                               bmu_ref, bsig_ref, beps_ref, o_ref, *, mxu_dtype):
    # Noisy-parameter fusion recomputed per grid step: ~K*N/2048 VALU cycles,
    # hidden under the MXU contraction.  No step-0 scratch init means both grid
    # axes stay "parallel" (megacore / v7x safe).
    w_eff = (wmu_ref[...] + wsig_ref[...] * weps_ref[...]).astype(mxu_dtype)
    b_eff = bmu_ref[...] + bsig_ref[...] * beps_ref[...]

    # Plain (tm, K) @ (K, N) contraction — no transposed MXU operand.
    y = jax.lax.dot_general(
        x_ref[...].astype(mxu_dtype), w_eff,
        dimension_numbers=(((1,), (0,)), ((), ())),
        preferred_element_type=jnp.float32,
    )
    o_ref[...] = (y + b_eff).astype(o_ref.dtype)


def _noisy_linear_eval_kernel(x_ref, wmu_ref, bmu_ref, o_ref):
    # Eval path: mean weights only, pre-cast to the MXU dtype in the wrapper
    # (half the DMA bytes, no per-tile VPU recast).  Only x is cast in-kernel.
    y = jax.lax.dot_general(
        x_ref[...].astype(wmu_ref.dtype), wmu_ref[...],
        dimension_numbers=(((1,), (0,)), ((), ())),
        preferred_element_type=jnp.float32,
    )
    o_ref[...] = (y + bmu_ref[...]).astype(o_ref.dtype)


# ----------------------------------------------------------------------------
# Wrapper
# ----------------------------------------------------------------------------

def noisy_linear_forward(x, weight_mu, weight_sigma, weight_epsilon,
                         bias_mu, bias_sigma, bias_epsilon,
                         *, training=True, tm=None, tn=None,
                         use_bf16_matmul=True):
    """Pallas implementation of NoisyLinear.forward.

    Weights follow the PyTorch convention (out_features, in_features); they are
    transposed / zero-padded once in the wrapper so the kernel contracts a
    lane-dense (K, N) operand and writes a lane-dense (tm, N) output.
    """
    B, in_features = x.shape
    out_features = weight_mu.shape[0]

    mxu_dtype = jnp.bfloat16 if use_bf16_matmul else jnp.float32
    mxu_bytes = 2 if use_bf16_matmul else 4
    f32 = 4

    # --- M tile: big tiles, pad ragged batches ------------------------------
    if tm is None:
        tm = B if B <= 512 else 256
    tm = max(8, min(tm, max(B, 8)))
    tm = _round_up(tm, 8)                      # sublane alignment
    b_padded = _round_up(B, tm)

    # --- K and N padded to multiples of 128 (zero rows/cols are a no-op) ----
    kp = _round_up(in_features, 128)
    np_full = _round_up(out_features, 128)

    vmem_cap = _tpu_vmem_capacity_bytes()
    budget = vmem_cap // 2                     # leave room for pipeline/overheads

    def _vmem_need(tn_):
        io = 2 * tm * kp * f32 + 2 * tm * tn_ * f32          # double-buffered x/out
        if training:
            return (io
                    + 3 * kp * tn_ * f32 + 3 * 8 * tn_ * f32  # single-buffered planes
                    + kp * tn_ * (f32 + mxu_bytes))           # in-kernel fused weight
        return io + kp * tn_ * mxu_bytes + 8 * tn_ * f32

    # --- N tile: full N unless the resident planes blow the VMEM budget -----
    if tn is None:
        tn = np_full
        if _vmem_need(tn) > budget:
            for cand in (2048, 1024, 512, 256, 128):
                if cand < np_full:
                    tn = cand
                    if _vmem_need(tn) <= budget:
                        break
    tn = _round_up(min(tn, np_full), 128)
    n_padded = _round_up(np_full, tn)

    # --- zero-pad operands ----------------------------------------------------
    if b_padded != B or kp != in_features:
        x = jnp.pad(x, ((0, b_padded - B), (0, kp - in_features)))
    pad_w = ((0, kp - in_features), (0, n_padded - out_features))
    pad_b = ((0, 0), (0, n_padded - out_features))

    grid = (n_padded // tn, b_padded // tm)    # outer N tiles, inner M tiles

    out_shape = jax.ShapeDtypeStruct((b_padded, n_padded), x.dtype)

    # Raise the scoped VMEM limit only when needed; ceiling is hardware-queried.
    vmem_kw = {}
    need = _vmem_need(tn)
    if need > 32 * 1024 * 1024:
        vmem_kw["vmem_limit_bytes"] = min(int(need * 1.25), int(vmem_cap * 0.9))

    flops = 2 * b_padded * kp * n_padded

    def _invoke(single_buffer_weights):
        w_mode = {}
        if single_buffer_weights and hasattr(pl, "Buffered"):
            # Grid-invariant along the batch axis: one buffer is enough.
            w_mode = dict(pipeline_mode=pl.Buffered(1))

        x_spec = pl.BlockSpec((tm, kp), lambda j, i: (i, 0))
        w_spec = pl.BlockSpec((kp, tn), lambda j, i: (0, j), **w_mode)
        b_spec = pl.BlockSpec((1, tn), lambda j, i: (0, j), **w_mode)
        out_spec = pl.BlockSpec((tm, tn), lambda j, i: (i, j))

        if training:
            wmu_t = jnp.pad(weight_mu.T, pad_w)
            wsig_t = jnp.pad(weight_sigma.T, pad_w)
            weps_t = jnp.pad(weight_epsilon.T, pad_w)
            bmu_2d = jnp.pad(bias_mu.reshape(1, out_features), pad_b)
            bsig_2d = jnp.pad(bias_sigma.reshape(1, out_features), pad_b)
            beps_2d = jnp.pad(bias_epsilon.reshape(1, out_features), pad_b)

            cost = pl.CostEstimate(
                flops=flops + 2 * kp * n_padded,
                transcendentals=0,
                bytes_accessed=(b_padded * kp * f32 + 3 * kp * n_padded * f32
                                + 3 * n_padded * f32 + b_padded * n_padded * f32))

            return pl.pallas_call(
                functools.partial(_noisy_linear_train_kernel, mxu_dtype=mxu_dtype),
                out_shape=out_shape,
                grid_spec=pltpu.PrefetchScalarGridSpec(
                    num_scalar_prefetch=0,
                    grid=grid,
                    in_specs=[x_spec,
                              w_spec, w_spec, w_spec,     # mu / sigma / epsilon
                              b_spec, b_spec, b_spec],
                    out_specs=out_spec,
                ),
                compiler_params=pltpu.CompilerParams(
                    dimension_semantics=("parallel", "parallel"), **vmem_kw),
                cost_estimate=cost,
            )(x, wmu_t, wsig_t, weps_t, bmu_2d, bsig_2d, beps_2d)

        # Eval: mean weights only, pre-cast to the MXU dtype.
        wmu_t = jnp.pad(weight_mu.T, pad_w).astype(mxu_dtype)
        bmu_2d = jnp.pad(bias_mu.reshape(1, out_features), pad_b)
        cost = pl.CostEstimate(
            flops=flops,
            transcendentals=0,
            bytes_accessed=(b_padded * kp * f32 + kp * n_padded * mxu_bytes
                            + n_padded * f32 + b_padded * n_padded * f32))
        return pl.pallas_call(
            _noisy_linear_eval_kernel,
            out_shape=out_shape,
            grid_spec=pltpu.PrefetchScalarGridSpec(
                num_scalar_prefetch=0,
                grid=grid,
                in_specs=[x_spec, w_spec, b_spec],
                out_specs=out_spec,
            ),
            compiler_params=pltpu.CompilerParams(
                dimension_semantics=("parallel", "parallel"), **vmem_kw),
            cost_estimate=cost,
        )(x, wmu_t, bmu_2d)

    try:
        y = _invoke(single_buffer_weights=True)
    except Exception:   # fallback for JAX builds that reject Buffered(1)
        y = _invoke(single_buffer_weights=False)

    if b_padded != B or n_padded != out_features:
        y = y[:B, :out_features]
    return y


# ----------------- deterministic parameter construction (mirrors __init__) ---

def _scale_noise(key, size):
    x = jax.random.normal(key, (size,), dtype=jnp.float32)
    return jnp.sign(x) * jnp.sqrt(jnp.abs(x))


def init_noisy_linear(key, in_features, out_features, std_init=0.4):
    k_wmu, k_bmu, k_ein, k_eout = jax.random.split(key, 4)
    mu_range = 1.0 / math.sqrt(in_features)

    weight_mu = jax.random.uniform(
        k_wmu, (out_features, in_features), jnp.float32, -mu_range, mu_range)
    weight_sigma = jnp.full((out_features, in_features),
                            std_init / math.sqrt(in_features), jnp.float32)
    bias_mu = jax.random.uniform(
        k_bmu, (out_features,), jnp.float32, -mu_range, mu_range)
    bias_sigma = jnp.full((out_features,),
                          std_init / math.sqrt(out_features), jnp.float32)

    # reset_noise(): factored Gaussian noise
    epsilon_in = _scale_noise(k_ein, in_features)
    epsilon_out = _scale_noise(k_eout, out_features)
    weight_epsilon = jnp.outer(epsilon_out, epsilon_in)
    bias_epsilon = epsilon_out

    return dict(weight_mu=weight_mu, weight_sigma=weight_sigma,
                weight_epsilon=weight_epsilon, bias_mu=bias_mu,
                bias_sigma=bias_sigma, bias_epsilon=bias_epsilon)


def reference_forward(x, p, training=True):
    if training:
        w = p["weight_mu"] + p["weight_sigma"] * p["weight_epsilon"]
        b = p["bias_mu"] + p["bias_sigma"] * p["bias_epsilon"]
    else:
        w, b = p["weight_mu"], p["bias_mu"]
    return x @ w.T + b


def _run(x, p, **kw):
    return jax.block_until_ready(noisy_linear_forward(
        x, p["weight_mu"], p["weight_sigma"], p["weight_epsilon"],
        p["bias_mu"], p["bias_sigma"], p["bias_epsilon"], **kw))


if __name__ == "__main__":
    key = jax.random.PRNGKey(0)
    k_p1, k_p2, k_x1, k_x2, k_x3 = jax.random.split(key, 5)

    # Layer 1: MXU-friendly shapes (K=64 -> padded 128, N=128).
    in1, out1 = 64, 128
    p1 = init_noisy_linear(k_p1, in1, out1)

    # Layer 2: awkward Rainbow-head-like shapes (K=33, N=48) -> exercises the
    # K/N zero-pad-to-128 path and output slicing, plus a ragged batch.
    in2, out2 = 33, 48
    p2 = init_noisy_linear(k_p2, in2, out2)

    x1 = jax.random.normal(k_x1, (12, in1), dtype=jnp.float32)
    x2 = jax.random.normal(k_x2, (192, in1), dtype=jnp.float32)
    x3 = jax.random.normal(k_x3, (7, in2), dtype=jnp.float32)

    # f32 MXU path (tight tolerance): single-tile and multi-M-tile grids.
    y1_train = _run(x1, p1, training=True, use_bf16_matmul=False)
    y1_eval = _run(x1, p1, training=False, use_bf16_matmul=False)
    y2_train = _run(x2, p1, training=True, tm=64, use_bf16_matmul=False)

    # Default bf16 MXU path (fusion + accumulation stay f32): loose tolerance.
    y2_bf16 = _run(x2, p1, training=True, tm=64)

    # Padded-K/N layer, ragged batch, both modes.
    y3_train = _run(x3, p2, training=True, use_bf16_matmul=False)
    y3_eval = _run(x3, p2, training=False)            # bf16 eval weights

    r1_train = reference_forward(x1, p1, training=True)
    r1_eval = reference_forward(x1, p1, training=False)
    r2_train = reference_forward(x2, p1, training=True)
    r3_train = reference_forward(x3, p2, training=True)
    r3_eval = reference_forward(x3, p2, training=False)

    assert y3_train.shape == (7, out2) and y3_eval.shape == (7, out2)
    assert jnp.allclose(y1_train, r1_train, atol=1e-4, rtol=1e-4)
    assert jnp.allclose(y1_eval, r1_eval, atol=1e-4, rtol=1e-4)
    assert jnp.allclose(y2_train, r2_train, atol=1e-4, rtol=1e-4)
    assert jnp.allclose(y3_train, r3_train, atol=1e-4, rtol=1e-4)
    assert jnp.allclose(y2_bf16, r2_train, atol=7.5e-2, rtol=0.0)
    assert jnp.allclose(y3_eval, r3_eval, atol=5e-2, rtol=0.0)

    print("KERNEL_OK")
</pallas_src>

<mosaic_0001>
module attributes {stable_mosaic.version = 11 : i64} {
  func.func @_noisy_linear_train_kernel(%arg0: i32, %arg1: i32, %arg2: memref<16x128xf32, #tpu.memory_space<vmem>>, %arg3: memref<128x128xf32, #tpu.memory_space<vmem>>, %arg4: memref<128x128xf32, #tpu.memory_space<vmem>>, %arg5: memref<128x128xf32, #tpu.memory_space<vmem>>, %arg6: memref<1x128xf32, #tpu.memory_space<vmem>>, %arg7: memref<1x128xf32, #tpu.memory_space<vmem>>, %arg8: memref<1x128xf32, #tpu.memory_space<vmem>>, %arg9: memref<16x128xf32, #tpu.memory_space<vmem>>) attributes {dimension_semantics = [#tpu.dimension_semantics<parallel>, #tpu.dimension_semantics<parallel>], iteration_bounds = array<i64: 1, 1>, scalar_prefetch = 0 : i64, scratch_operands = 0 : i64, tpu.core_type = #tpu.core_type<tc>, window_params = [{transform_indices = @transform_0, window_bounds = array<i64: 16, 128>}, {pipeline_mode = #tpu.pipeline_mode<synchronous>, transform_indices = @transform_1, window_bounds = array<i64: 128, 128>}, {pipeline_mode = #tpu.pipeline_mode<synchronous>, transform_indices = @transform_2, window_bounds = array<i64: 128, 128>}, {pipeline_mode = #tpu.pipeline_mode<synchronous>, transform_indices = @transform_3, window_bounds = array<i64: 128, 128>}, {pipeline_mode = #tpu.pipeline_mode<synchronous>, transform_indices = @transform_4, window_bounds = array<i64: 1, 128>}, {pipeline_mode = #tpu.pipeline_mode<synchronous>, transform_indices = @transform_5, window_bounds = array<i64: 1, 128>}, {pipeline_mode = #tpu.pipeline_mode<synchronous>, transform_indices = @transform_6, window_bounds = array<i64: 1, 128>}, {transform_indices = @transform_7, window_bounds = array<i64: 16, 128>}]} {
    %c0 = arith.constant 0 : index
    %c0_0 = arith.constant 0 : index
    %0 = vector.load %arg3[%c0, %c0_0] : memref<128x128xf32, #tpu.memory_space<vmem>>, vector<128x128xf32>
    %c0_1 = arith.constant 0 : index
    %c0_2 = arith.constant 0 : index
    %1 = vector.load %arg4[%c0_1, %c0_2] : memref<128x128xf32, #tpu.memory_space<vmem>>, vector<128x128xf32>
    %c0_3 = arith.constant 0 : index
    %c0_4 = arith.constant 0 : index
    %2 = vector.load %arg5[%c0_3, %c0_4] : memref<128x128xf32, #tpu.memory_space<vmem>>, vector<128x128xf32>
    %3 = arith.mulf %1, %2 : vector<128x128xf32>
    %4 = arith.addf %0, %3 : vector<128x128xf32>
    %c0_5 = arith.constant 0 : index
    %c0_6 = arith.constant 0 : index
    %5 = vector.load %arg6[%c0_5, %c0_6] : memref<1x128xf32, #tpu.memory_space<vmem>>, vector<1x128xf32>
    %c0_7 = arith.constant 0 : index
    %c0_8 = arith.constant 0 : index
    %6 = vector.load %arg7[%c0_7, %c0_8] : memref<1x128xf32, #tpu.memory_space<vmem>>, vector<1x128xf32>
    %c0_9 = arith.constant 0 : index
    %c0_10 = arith.constant 0 : index
    %7 = vector.load %arg8[%c0_9, %c0_10] : memref<1x128xf32, #tpu.memory_space<vmem>>, vector<1x128xf32>
    %8 = arith.mulf %6, %7 : vector<1x128xf32>
    %9 = arith.addf %5, %8 : vector<1x128xf32>
    %c0_11 = arith.constant 0 : index
    %c0_12 = arith.constant 0 : index
    %10 = vector.load %arg2[%c0_11, %c0_12] : memref<16x128xf32, #tpu.memory_space<vmem>>, vector<16x128xf32>
    %cst = arith.constant dense<0.000000e+00> : vector<16x128xf32>
    %11 = tpu.matmul %10, %4, %cst {dimension_numbers = #tpu.dot_dimension_numbers<[1], [0], [0], [1], [0, 0, 1, 1], [], []>} : vector<16x128xf32>, vector<128x128xf32>, vector<16x128xf32> -> vector<16x128xf32>
    %12 = vector.broadcast %9 : vector<1x128xf32> to vector<16x128xf32>
    %13 = arith.addf %11, %12 : vector<16x128xf32>
    %c0_13 = arith.constant 0 : index
    %c0_14 = arith.constant 0 : index
    %14 = vector.load %arg9[%c0_13, %c0_14] : memref<16x128xf32, #tpu.memory_space<vmem>>, vector<16x128xf32>
    tpu.vector_store %arg9[%c0_13, %c0_14], %13 {strides = array<i32>} : memref<16x128xf32, #tpu.memory_space<vmem>>, vector<16x128xf32>,
    return
  }
  func.func @transform_0(%arg0: i32, %arg1: i32) -> (i32, i32) {
    %c0_i32 = arith.constant 0 : i32
    %c0_i32_0 = arith.constant 0 : i32
    return %arg1, %c0_i32 : i32, i32
  }
  func.func @transform_1(%arg0: i32, %arg1: i32) -> (i32, i32) {
    %c0_i32 = arith.constant 0 : i32
    %c0_i32_0 = arith.constant 0 : i32
    return %c0_i32, %arg0 : i32, i32
  }
  func.func @transform_2(%arg0: i32, %arg1: i32) -> (i32, i32) {
    %c0_i32 = arith.constant 0 : i32
    %c0_i32_0 = arith.constant 0 : i32
    return %c0_i32, %arg0 : i32, i32
  }
  func.func @transform_3(%arg0: i32, %arg1: i32) -> (i32, i32) {
    %c0_i32 = arith.constant 0 : i32
    %c0_i32_0 = arith.constant 0 : i32
    return %c0_i32, %arg0 : i32, i32
  }
  func.func @transform_4(%arg0: i32, %arg1: i32) -> (i32, i32) {
    %c0_i32 = arith.constant 0 : i32
    %c0_i32_0 = arith.constant 0 : i32
    return %c0_i32, %arg0 : i32, i32
  }
  func.func @transform_5(%arg0: i32, %arg1: i32) -> (i32, i32) {
    %c0_i32 = arith.constant 0 : i32
    %c0_i32_0 = arith.constant 0 : i32
    return %c0_i32, %arg0 : i32, i32
  }
  func.func @transform_6(%arg0: i32, %arg1: i32) -> (i32, i32) {
    %c0_i32 = arith.constant 0 : i32
    %c0_i32_0 = arith.constant 0 : i32
    return %c0_i32, %arg0 : i32, i32
  }
  func.func @transform_7(%arg0: i32, %arg1: i32) -> (i32, i32) {
    %c0_i32 = arith.constant 0 : i32
    return %arg1, %arg0 : i32, i32
  }
}

module attributes {stable_mosaic.version = 11 : i64} {
  func.func @_noisy_linear_train_kernel(%arg0: i32, %arg1: i32, %arg2: memref<16x128xf32, #tpu.memory_space<vmem>>, %arg3: memref<128x128xf32, #tpu.memory_space<vmem>>, %arg4: memref<128x128xf32, #tpu.memory_space<vmem>>, %arg5: memref<128x128xf32, #tpu.memory_space<vmem>>, %arg6: memref<1x128xf32, #tpu.memory_space<vmem>>, %arg7: memref<1x128xf32, #tpu.memory_space<vmem>>, %arg8: memref<1x128xf32, #tpu.memory_space<vmem>>, %arg9: memref<16x128xf32, #tpu.memory_space<vmem>>) attributes {dimension_semantics = [#tpu.dimension_semantics<parallel>, #tpu.dimension_semantics<parallel>], iteration_bounds = array<i64: 1, 1>, scalar_prefetch = 0 : i64, scratch_operands = 0 : i64, tpu.core_type = #tpu.core_type<tc>, window_params = [{transform_indices = @transform_0, window_bounds = array<i64: 16, 128>}, {transform_indices = @transform_1, window_bounds = array<i64: 128, 128>}, {transform_indices = @transform_2, window_bounds = array<i64: 128, 128>}, {transform_indices = @transform_3, window_bounds = array<i64: 128, 128>}, {transform_indices = @transform_4, window_bounds = array<i64: 1, 128>}, {transform_indices = @transform_5, window_bounds = array<i64: 1, 128>}, {transform_indices = @transform_6, window_bounds = array<i64: 1, 128>}, {transform_indices = @transform_7, window_bounds = array<i64: 16, 128>}]} {
    %c0 = arith.constant 0 : index
    %c0_0 = arith.constant 0 : index
    %0 = vector.load %arg3[%c0, %c0_0] : memref<128x128xf32, #tpu.memory_space<vmem>>, vector<128x128xf32>
    %c0_1 = arith.constant 0 : index
    %c0_2 = arith.constant 0 : index
    %1 = vector.load %arg4[%c0_1, %c0_2] : memref<128x128xf32, #tpu.memory_space<vmem>>, vector<128x128xf32>
    %c0_3 = arith.constant 0 : index
    %c0_4 = arith.constant 0 : index
    %2 = vector.load %arg5[%c0_3, %c0_4] : memref<128x128xf32, #tpu.memory_space<vmem>>, vector<128x128xf32>
    %3 = arith.mulf %1, %2 : vector<128x128xf32>
    %4 = arith.addf %0, %3 : vector<128x128xf32>
    %c0_5 = arith.constant 0 : index
    %c0_6 = arith.constant 0 : index
    %5 = vector.load %arg6[%c0_5, %c0_6] : memref<1x128xf32, #tpu.memory_space<vmem>>, vector<1x128xf32>
    %c0_7 = arith.constant 0 : index
    %c0_8 = arith.constant 0 : index
    %6 = vector.load %arg7[%c0_7, %c0_8] : memref<1x128xf32, #tpu.memory_space<vmem>>, vector<1x128xf32>
    %c0_9 = arith.constant 0 : index
    %c0_10 = arith.constant 0 : index
    %7 = vector.load %arg8[%c0_9, %c0_10] : memref<1x128xf32, #tpu.memory_space<vmem>>, vector<1x128xf32>
    %8 = arith.mulf %6, %7 : vector<1x128xf32>
    %9 = arith.addf %5, %8 : vector<1x128xf32>
    %c0_11 = arith.constant 0 : index
    %c0_12 = arith.constant 0 : index
    %10 = vector.load %arg2[%c0_11, %c0_12] : memref<16x128xf32, #tpu.memory_space<vmem>>, vector<16x128xf32>
    %cst = arith.constant dense<0.000000e+00> : vector<16x128xf32>
    %11 = tpu.matmul %10, %4, %cst {dimension_numbers = #tpu.dot_dimension_numbers<[1], [0], [0], [1], [0, 0, 1, 1], [], []>} : vector<16x128xf32>, vector<128x128xf32>, vector<16x128xf32> -> vector<16x128xf32>
    %12 = vector.broadcast %9 : vector<1x128xf32> to vector<16x128xf32>
    %13 = arith.addf %11, %12 : vector<16x128xf32>
    %c0_13 = arith.constant 0 : index
    %c0_14 = arith.constant 0 : index
    %14 = vector.load %arg9[%c0_13, %c0_14] : memref<16x128xf32, #tpu.memory_space<vmem>>, vector<16x128xf32>
    tpu.vector_store %arg9[%c0_13, %c0_14], %13 {strides = array<i32>} : memref<16x128xf32, #tpu.memory_space<vmem>>, vector<16x128xf32>,
    return
  }
  func.func @transform_0(%arg0: i32, %arg1: i32) -> (i32, i32) {
    %c0_i32 = arith.constant 0 : i32
    %c0_i32_0 = arith.constant 0 : i32
    return %arg1, %c0_i32 : i32, i32
  }
  func.func @transform_1(%arg0: i32, %arg1: i32) -> (i32, i32) {
    %c0_i32 = arith.constant 0 : i32
    %c0_i32_0 = arith.constant 0 : i32
    return %c0_i32, %arg0 : i32, i32
  }
  func.func @transform_2(%arg0: i32, %arg1: i32) -> (i32, i32) {
    %c0_i32 = arith.constant 0 : i32
    %c0_i32_0 = arith.constant 0 : i32
    return %c0_i32, %arg0 : i32, i32
  }
  func.func @transform_3(%arg0: i32, %arg1: i32) -> (i32, i32) {
    %c0_i32 = arith.constant 0 : i32
    %c0_i32_0 = arith.constant 0 : i32
    return %c0_i32, %arg0 : i32, i32
  }
  func.func @transform_4(%arg0: i32, %arg1: i32) -> (i32, i32) {
    %c0_i32 = arith.constant 0 : i32
    %c0_i32_0 = arith.constant 0 : i32
    return %c0_i32, %arg0 : i32, i32
  }
  func.func @transform_5(%arg0: i32, %arg1: i32) -> (i32, i32) {
    %c0_i32 = arith.constant 0 : i32
    %c0_i32_0 = arith.constant 0 : i32
    return %c0_i32, %arg0 : i32, i32
  }
  func.func @transform_6(%arg0: i32, %arg1: i32) -> (i32, i32) {
    %c0_i32 = arith.constant 0 : i32
    %c0_i32_0 = arith.constant 0 : i32
    return %c0_i32, %arg0 : i32, i32
  }
  func.func @transform_7(%arg0: i32, %arg1: i32) -> (i32, i32) {
    %c0_i32 = arith.constant 0 : i32
    return %arg1, %arg0 : i32, i32
  }
}

</mosaic_0001>

<bundles_post_ra>
// kernel: tpu_custom_call.1
= control target key start
LH: loop header
LB: loop body
LE: loop exit
PB: predicated region body
PF: predicated region fallthrough
CT: control target
= control target key end

     0   :  { %12 = vsyncpa [#allocation3], 0  ;;  %s525_s0 = inlined_call_operand.hbm [shape: f32[16,128], index: 0, kind: input, shape index: {}]   ;;  %s526_s1 = inlined_call_operand.hbm [shape: f32[128,128], index: 1, kind: input, shape index: {}]   ;;  %s527_s2 = inlined_call_operand.hbm [shape: f32[128,128], index: 2, kind: input, shape index: {}]   ;;  %s528_s3 = inlined_call_operand.hbm [shape: f32[128,128], index: 3, kind: input, shape index: {}]   ;;  %s529_s4 = inlined_call_operand.vmem [shape: f32[1,128], index: 4, kind: input, shape index: {}]   ;;  %s530_s5 = inlined_call_operand.vmem [shape: f32[1,128], index: 5, kind: input, shape index: {}]   ;;  %s531_s6 = inlined_call_operand.vmem [shape: f32[1,128], index: 6, kind: input, shape index: {}]   ;;  %s532_s7 = inlined_call_operand.hbm [shape: f32[16,128], index: 7, kind: output, shape index: {}]  }
   0x1   :  { %13 = vsyncpa [#allocation6], 0 }
   0x2   :  { %14 = vsyncpa [#allocation9], 0 }
   0x3   :  { %15 = vsyncpa [#allocation4], 0  ;;  %s439_s24 = smov [#allocation5]   ;;  %s440_s26 = smov [#allocation2]  }
   0x4   :  { %s33_s25 = sshll.u32 %s439_s24, 4  ;;  %s21_s27 = sshll.u32 %s440_s26, 4  ;;  %s34_s25 = int_to_ptr.vmem [resolvable:$true] %s33_s25  ;;  %s22_s27 = int_to_ptr.vmem [resolvable:$true] %s21_s27 }
   0x5   :  { %s339_s28 = scalar_lea.vmem %s34_s25, 2048  ;;  %p344_p1 = scmp.lt.s32.totalorder %s34_s25, %s34_s25 }
   0x6   :  { %p340_p0 = scmp.ne.s32.totalorder %s34_s25, %s339_s28  ;;  %p345_p2 = scmp.lt.s32.totalorder %s339_s28, %s339_s28 }
   0x8   :  { %p346_p3 = por %p345_p2, %p344_p1 }
   0xa   :  { %p347_p4 = pnand %p346_p3, %p340_p0 }
   0xc   :  { %350 = shalt.err (!%p347_p4)
}
   0xd   :  { %s441_s29 = smov 128   ;;  %s442_s30 = smov 8  }
   0xe   :  { %39 = dma.hbm_to_vmem [thread:$0]  %s526_s1, 2048, %s34_s25, [#allocation6], %s441_s29, %s441_s29, %s442_s30  }
   0xf   :  { %s359_s10 = scalar_lea.vmem %s22_s27, 256  ;;  %p364_p6 = scmp.lt.s32.totalorder %s22_s27, %s22_s27 }
  0x10   :  { %p360_p5 = scmp.ne.s32.totalorder %s22_s27, %s359_s10  ;;  %p365_p7 = scmp.lt.s32.totalorder %s359_s10, %s359_s10 }
  0x12   :  { %p366_p8 = por %p365_p7, %p364_p6 }
  0x14   :  { %p367_p9 = pnand %p366_p8, %p360_p5 }
  0x16   :  { %370 = shalt.err (!%p367_p9)
}
  0x17   :  { %27 = dma.hbm_to_vmem [thread:$0]  %s525_s0, 256, %s22_s27, [#allocation3], %s441_s29, %s441_s29, %s442_s30  }
  0x18   :  { %s443_s13 = smov [#allocation7]   ;;  %s444_s15 = smov [#allocation8]  }
  0x19   :  { %s45_s14 = sshll.u32 %s443_s13, 4  ;;  %s57_s16 = sshll.u32 %s444_s15, 4  ;;  %s46_s14 = int_to_ptr.vmem [resolvable:$true] %s45_s14  ;;  %s58_s16 = int_to_ptr.vmem [resolvable:$true] %s57_s16 }
  0x1a   :  { %s379_s1 = scalar_lea.vmem %s46_s14, 2048  ;;  %p384_p11 = scmp.lt.s32.totalorder %s46_s14, %s46_s14 }
  0x1b   :  { %p380_p10 = scmp.ne.s32.totalorder %s46_s14, %s379_s1  ;;  %p385_p12 = scmp.lt.s32.totalorder %s379_s1, %s379_s1 }
  0x1d   :  { %p386_p13 = por %p385_p12, %p384_p11 }
  0x1f   :  { %p387_p0 = pnand %p386_p13, %p380_p10 }
  0x21   :  { %390 = shalt.err (!%p387_p0)
}
  0x22   :  { %51 = dma.hbm_to_vmem [thread:$0]  %s527_s2, 2048, %s46_s14, [#allocation6], %s441_s29, %s441_s29, %s442_s30  }
  0x23   :  { %s399_s0 = scalar_lea.vmem %s58_s16, 2048  ;;  %p404_p2 = scmp.lt.s32.totalorder %s58_s16, %s58_s16 }
  0x24   :  { %p400_p1 = scmp.ne.s32.totalorder %s58_s16, %s399_s0  ;;  %p405_p3 = scmp.lt.s32.totalorder %s399_s0, %s399_s0 }
  0x26   :  { %p406_p4 = por %p405_p3, %p404_p2 }
  0x28   :  { %p407_p5 = pnand %p406_p4, %p400_p1 }
  0x2a   :  { %410 = shalt.err (!%p407_p5)
}
  0x2b   :  { %63 = dma.hbm_to_vmem [thread:$0]  %s528_s3, 2048, %s58_s16, [#allocation9], %s441_s29, %s441_s29, %s442_s30  }
  0x2c   :  { %431 = dma.done.wait [#allocation3], 256  }
  0x2d   :  { %432 = vsyncadd [#allocation3], 4294967040 }
  0x2e   :  { %433 = dma.done.wait [#allocation6], 4096  }
  0x2f   :  { %434 = vsyncadd [#allocation6], 4294963200 }
  0x30   :  { %435 = dma.done.wait [#allocation9], 2048  }
  0x31   :  { %436 = vsyncadd [#allocation9], 4294965248  ;;  %v97_v0 = vld [vmem:[#allocation5 + $0x78] sm:$0xff]  ;;  %v96_v4 = vld [vmem:[#allocation5 + $0x70] sm:$0xff]  ;;  %s445_s25 = smov [#allocation10]  }
  0x32   :  { %v113_v1 = vld [vmem:[#allocation7 + $0x78] sm:$0xff]  ;;  %v112_v5 = vld [vmem:[#allocation7 + $0x70] sm:$0xff]  ;;  %v95_v8 = vld [vmem:[#allocation5 + $0x68] sm:$0xff]  ;;  %s257_s26 = sshll.u32 %s445_s25, 4  ;;  %s258_s26 = int_to_ptr.vmem [resolvable:$true] %s257_s26 }
  0x33   :  { %v129_v2 = vld [vmem:[#allocation8 + $0x78] sm:$0xff]  ;;  %v128_v6 = vld [vmem:[#allocation8 + $0x70] sm:$0xff]  ;;  %v111_v9 = vld [vmem:[#allocation7 + $0x68] sm:$0xff]  ;;  %p416_p7 = scmp.lt.s32.totalorder %s258_s26, %s258_s26 }
  0x34   :  { %v145_v3 = vmul.f32 %v129_v2, %v113_v1  ;;  %v144_v7 = vmul.f32 %v128_v6, %v112_v5  ;;  %v127_v10 = vld [vmem:[#allocation8 + $0x68] sm:$0xff]  ;;  %v110_v13 = vld [vmem:[#allocation7 + $0x60] sm:$0xff]  ;;  %v109_v18 = vld [vmem:[#allocation7 + $0x58] sm:$0xff] }
  0x35   :  { %v143_v12 = vmul.f32 %v127_v10, %v111_v9  ;;  %v126_v14 = vld [vmem:[#allocation8 + $0x60] sm:$0xff]  ;;  %v125_v19 = vld [vmem:[#allocation8 + $0x58] sm:$0xff]  ;;  %v108_v22 = vld [vmem:[#allocation7 + $0x50] sm:$0xff] }
  0x36   :  { %v161_v11 = vadd.f32 %v145_v3, %v97_v0  ;;  %v160_v15 = vadd.f32 %v144_v7, %v96_v4  ;;  %v94_v16 = vld [vmem:[#allocation5 + $0x60] sm:$0xff]  ;;  %v142_v17 = vmul.f32 %v126_v14, %v110_v13  ;;  %v141_v21 = vmul.f32 %v125_v19, %v109_v18  ;;  %v124_v23 = vld [vmem:[#allocation8 + $0x50] sm:$0xff]  ;;  %v93_v24 = vld [vmem:[#allocation5 + $0x58] sm:$0xff] }
  0x37   :  { %v159_v20 = vadd.f32 %v143_v12, %v95_v8  ;;  %v107_v25 = vld [vmem:[#allocation7 + $0x48] sm:$0xff]  ;;  %v140_v28 = vmul.f32 %v124_v23, %v108_v22  ;;  %v92_v29 = vld [vmem:[#allocation5 + $0x50] sm:$0xff]  ;;  %v106_v30 = vld [vmem:[#allocation7 + $0x40] sm:$0xff]  ;;  %v170_v18 = vlaneseq }
  0x38   :  { %289 = vmatprep.subr.mxu0 %v161_v11  ;;  %v123_v26 = vld [vmem:[#allocation8 + $0x48] sm:$0xff]  ;;  %v158_v27 = vadd.f32 %v142_v17, %v94_v16  ;;  %v122_v31 = vld [vmem:[#allocation8 + $0x40] sm:$0xff]  ;;  %v157_v32 = vadd.f32 %v141_v21, %v93_v24  ;;  %v105_v35 = vld [vmem:[#allocation7 + $0x38] sm:$0xff] }
  0x39   :  { %290 = vmatpush3.msra.mxu0 %v161_v11  ;;  %v139_v33 = vmul.f32 %v123_v26, %v107_v25  ;;  %v91_v34 = vld [vmem:[#allocation5 + $0x48] sm:$0xff]  ;;  %v121_v36 = vld [vmem:[#allocation8 + $0x38] sm:$0xff]  ;;  %v156_v37 = vadd.f32 %v140_v28, %v92_v29  ;;  %v138_v38 = vmul.f32 %v122_v31, %v106_v30  ;;  %v90_v39 = vld [vmem:[#allocation5 + $0x40] sm:$0xff]  ;;  %v171_v22 = vshrl.u32 %v170_v18, 7 }
  0x3a   :  { %291 = vmatprep.subr.mxu0 %v160_v15  ;;  %v104_v40 = vld [vmem:[#allocation7 + $0x30] sm:$0xff]  ;;  %v137_v43 = vmul.f32 %v121_v36, %v105_v35  ;;  %v89_v44 = vld [vmem:[#allocation5 + $0x38] sm:$0xff]  ;;  %v103_v45 = vld [vmem:[#allocation7 + $0x28] sm:$0xff] }
  0x3b   :  { %292 = vmatpush3.msra.mxu0 %v160_v15  ;;  %v120_v41 = vld [vmem:[#allocation8 + $0x30] sm:$0xff]  ;;  %v155_v42 = vadd.f32 %v139_v33, %v91_v34  ;;  %v119_v46 = vld [vmem:[#allocation8 + $0x28] sm:$0xff]  ;;  %v154_v47 = vadd.f32 %v138_v38, %v90_v39  ;;  %v102_v50 = vld [vmem:[#allocation7 + $0x20] sm:$0xff]  ;;  %v172_v25 = vsub.s32 0, %v171_v22 }
  0x3c   :  { %293 = vmatprep.subr.mxu0 %v159_v20  ;;  %v88_v48 = vld [vmem:[#allocation5 + $0x30] sm:$0xff]  ;;  %v136_v49 = vmul.f32 %v120_v41, %v104_v40  ;;  %v118_v51 = vld [vmem:[#allocation8 + $0x20] sm:$0xff]  ;;  %v153_v53 = vadd.f32 %v137_v43, %v89_v44  ;;  %v135_v54 = vmul.f32 %v119_v46, %v103_v45  ;;  %v87_v55 = vld [vmem:[#allocation5 + $0x28] sm:$0xff] }
  0x3d   :  { %294 = vmatpush3.msra.mxu0 %v159_v20  ;;  %v167_v52 = vld [vmem:[#allocation2] sm:$0xff]  ;;  %v101_v56 = vld [vmem:[#allocation7 + $0x18] sm:$0xff]  ;;  %v134_v59 = vmul.f32 %v118_v51, %v102_v50  ;;  %v86_v60 = vld [vmem:[#allocation5 + $0x20] sm:$0xff] }
  0x3e   :  { %295 = vmatprep.subr.mxu0 %v158_v27  ;;  %321 = vmatprep.mubr.f32.mxu0 %v167_v52  ;;  %v117_v57 = vld [vmem:[#allocation8 + $0x18] sm:$0xff]  ;;  %v152_v58 = vadd.f32 %v136_v49, %v88_v48  ;;  %v100_v61 = vld [vmem:[#allocation7 + $0x10] sm:$0xff]  ;;  %v151_v63 = vadd.f32 %v135_v54, %v87_v55  ;;  %v99_v2 = vld [vmem:[#allocation7 + $0x8] sm:$0xff] }
  0x3f   :  { %296 = vmatpush3.msra.mxu0 %v158_v27  ;;  %v116_v62 = vld [vmem:[#allocation8 + $0x10] sm:$0xff]  ;;  %v133_v0 = vmul.f32 %v117_v57, %v101_v56  ;;  %v85_v1 = vld [vmem:[#allocation5 + $0x18] sm:$0xff]  ;;  %v115_v3 = vld [vmem:[#allocation8 + $0x8] sm:$0xff]  ;;  %v150_v4 = vadd.f32 %v134_v59, %v86_v60 }
  0x40   :  { %297 = vmatprep.subr.mxu0 %v157_v32  ;;  %v132_v5 = vmul.f32 %v116_v62, %v100_v61  ;;  %v84_v6 = vld [vmem:[#allocation5 + $0x10] sm:$0xff]  ;;  %v98_v7 = vld [vmem:[#allocation7] sm:$0xff]  ;;  %v131_v10 = vmul.f32 %v115_v3, %v99_v2  ;;  %v83_v11 = vld [vmem:[#allocation5 + $0x8] sm:$0xff] }
  0x41   :  { %298 = vmatpush3.msra.mxu0 %v157_v32  ;;  %v114_v8 = vld [vmem:[#allocation8] sm:$0xff]  ;;  %v149_v9 = vadd.f32 %v133_v0, %v85_v1  ;;  %v168_v17 = vld [vmem:[#allocation2 + $0x8] sm:$0xff]  ;;  %v163_v19 = vld [vmem:[%s530_s5] sm:$0x1]  ;;  %s411_s5 = scalar_lea.vmem %s258_s26, 256 }
  0x42   :  { %299 = vmatprep.subr.mxu0 %v156_v37  ;;  %v148_v12 = vadd.f32 %v132_v5, %v84_v6  ;;  %v130_v13 = vmul.f32 %v114_v8, %v98_v7  ;;  %v82_v14 = vld [vmem:[#allocation5] sm:$0xff]  ;;  %v147_v15 = vadd.f32 %v131_v10, %v83_v11  ;;  %v164_v20 = vld [vmem:[%s531_s6] sm:$0x1]  ;;  %p412_p6 = scmp.ne.s32.totalorder %s258_s26, %s411_s5  ;;  %p417_p8 = scmp.lt.s32.totalorder %s411_s5, %s411_s5 }
  0x43   :  { %300 = vmatpush3.msra.mxu0 %v156_v37  ;;  %v165_v21 = vmul.f32 %v164_v20, %v163_v19  ;;  %v162_v23 = vld [vmem:[%s529_s4] sm:$0x1] }
  0x44   :  { %301 = vmatprep.subr.mxu0 %v155_v42  ;;  %v146_v16 = vadd.f32 %v130_v13, %v82_v14  ;;  %p418_p9 = por %p417_p8, %p416_p7 }
  0x45   :  { %302 = vmatpush3.msra.mxu0 %v155_v42  ;;  %v166_v24 = vadd.f32 %v165_v21, %v162_v23 }
  0x46   :  { %303 = vmatprep.subr.mxu0 %v154_v47  ;;  %p419_p10 = pnand %p418_p9, %p412_p6 }
  0x47   :  { %304 = vmatpush3.msra.mxu0 %v154_v47  ;;  %v173_v26 = vrot.slane %v166_v24, %v172_v25 }
  0x48   :  { %305 = vmatprep.subr.mxu0 %v153_v53 }
  0x49   :  { %306 = vmatpush3.msra.mxu0 %v153_v53 }
  0x4a   :  { %307 = vmatprep.subr.mxu0 %v152_v58 }
  0x4b   :  { %308 = vmatpush3.msra.mxu0 %v152_v58 }
  0x4c   :  { %309 = vmatprep.subr.mxu0 %v151_v63 }
  0x4d   :  { %310 = vmatpush3.msra.mxu0 %v151_v63 }
  0x4e   :  { %311 = vmatprep.subr.mxu0 %v150_v4 }
  0x4f   :  { %312 = vmatpush3.msra.mxu0 %v150_v4 }
  0x50   :  { %313 = vmatprep.subr.mxu0 %v149_v9 }
  0x51   :  { %314 = vmatpush3.msra.mxu0 %v149_v9 }
  0x52   :  { %315 = vmatprep.subr.mxu0 %v148_v12 }
  0x53   :  { %316 = vmatpush3.msra.mxu0 %v148_v12 }
  0x54   :  { %317 = vmatprep.subr.mxu0 %v147_v15 }
  0x55   :  { %318 = vmatpush3.msra.mxu0 %v147_v15 }
  0x56   :  { %319 = vmatprep.subr.mxu0 %v146_v16 }
  0x57   :  { %320 = vmatpush3.msra.mxu0 %v146_v16 }
  0x58   :  { %322 = vmatmul.mubr.f32.vlgmr.msra.gmra.mxu0 %v168_v17 }
 0x118   :  { %v323_v27 = vpop.f32.mrf.mxu0 }
 0x119   :  { %v247_v28 = vadd.f32 %v323_v27, %v173_v26 }
 0x11a   :  { %v241_v29 = vpop.f32.mrf.mxu0 }
 0x11b   :  { %251 = vst [vmem:[#allocation10 + $0x8] sm:$0xff] %v247_v28  ;;  %v242_v30 = vadd.f32 %v241_v29, %v173_v26 }
 0x11d   :  { %250 = vst [vmem:[#allocation10] sm:$0xff] %v242_v30 }
 0x11e   :  { %422 = shalt.err (!%p419_p10)
}
 0x11f   :  { %263 = dma.vmem_to_hbm [thread:$0]  %s258_s26, 256, %s532_s7, [#allocation4], %s441_s29, %s441_s29, %s442_s30  }
 0x120   :  { %437 = dma.done.wait [#allocation4], 256  }
 0x121   :  { %438 = vsyncadd [#allocation4], 4294967040 }
 0x122   :  { %267 = vsyncpa [#allocation3], 1 }
 0x123   :  { %268 = vsyncpa [#allocation6], 1 }
 0x124   :  { %269 = vsyncpa [#allocation9], 1 }
 0x125   :  { %270 = vsyncpa [#allocation4], 1 }

// kernel: tpu_custom_call.1
= control target key start
LH: loop header
LB: loop body
LE: loop exit
PB: predicated region body
PF: predicated region fallthrough
CT: control target
= control target key end

     0   :  { %12 = vsyncpa [#allocation3], 0  ;;  %s525_s0 = inlined_call_operand.hbm [shape: f32[16,128], index: 0, kind: input, shape index: {}]   ;;  %s526_s1 = inlined_call_operand.hbm [shape: f32[128,128], index: 1, kind: input, shape index: {}]   ;;  %s527_s2 = inlined_call_operand.hbm [shape: f32[128,128], index: 2, kind: input, shape index: {}]   ;;  %s528_s3 = inlined_call_operand.hbm [shape: f32[128,128], index: 3, kind: input, shape index: {}]   ;;  %s529_s4 = inlined_call_operand.vmem [shape: f32[1,128], index: 4, kind: input, shape index: {}]   ;;  %s530_s5 = inlined_call_operand.vmem [shape: f32[1,128], index: 5, kind: input, shape index: {}]   ;;  %s531_s6 = inlined_call_operand.vmem [shape: f32[1,128], index: 6, kind: input, shape index: {}]   ;;  %s532_s7 = inlined_call_operand.hbm [shape: f32[16,128], index: 7, kind: output, shape index: {}]  }
   0x1   :  { %13 = vsyncpa [#allocation6], 0 }
   0x2   :  { %14 = vsyncpa [#allocation9], 0 }
   0x3   :  { %15 = vsyncpa [#allocation4], 0  ;;  %s439_s24 = smov [#allocation5]   ;;  %s440_s26 = smov [#allocation2]  }
   0x4   :  { %s33_s25 = sshll.u32 %s439_s24, 4  ;;  %s21_s27 = sshll.u32 %s440_s26, 4  ;;  %s34_s25 = int_to_ptr.vmem [resolvable:$true] %s33_s25  ;;  %s22_s27 = int_to_ptr.vmem [resolvable:$true] %s21_s27 }
   0x5   :  { %s339_s28 = scalar_lea.vmem %s34_s25, 2048  ;;  %p344_p1 = scmp.lt.s32.totalorder %s34_s25, %s34_s25 }
   0x6   :  { %p340_p0 = scmp.ne.s32.totalorder %s34_s25, %s339_s28  ;;  %p345_p2 = scmp.lt.s32.totalorder %s339_s28, %s339_s28 }
   0x8   :  { %p346_p3 = por %p345_p2, %p344_p1 }
   0xa   :  { %p347_p4 = pnand %p346_p3, %p340_p0 }
   0xc   :  { %350 = shalt.err (!%p347_p4)
}
   0xd   :  { %s441_s29 = smov 128   ;;  %s442_s30 = smov 8  }
   0xe   :  { %39 = dma.hbm_to_vmem [thread:$0]  %s526_s1, 2048, %s34_s25, [#allocation6], %s441_s29, %s441_s29, %s442_s30  }
   0xf   :  { %s359_s10 = scalar_lea.vmem %s22_s27, 256  ;;  %p364_p6 = scmp.lt.s32.totalorder %s22_s27, %s22_s27 }
  0x10   :  { %p360_p5 = scmp.ne.s32.totalorder %s22_s27, %s359_s10  ;;  %p365_p7 = scmp.lt.s32.totalorder %s359_s10, %s359_s10 }
  0x12   :  { %p366_p8 = por %p365_p7, %p364_p6 }
  0x14   :  { %p367_p9 = pnand %p366_p8, %p360_p5 }
  0x16   :  { %370 = shalt.err (!%p367_p9)
}
  0x17   :  { %27 = dma.hbm_to_vmem [thread:$0]  %s525_s0, 256, %s22_s27, [#allocation3], %s441_s29, %s441_s29, %s442_s30  }
  0x18   :  { %s443_s13 = smov [#allocation7]   ;;  %s444_s15 = smov [#allocation8]  }
  0x19   :  { %s45_s14 = sshll.u32 %s443_s13, 4  ;;  %s57_s16 = sshll.u32 %s444_s15, 4  ;;  %s46_s14 = int_to_ptr.vmem [resolvable:$true] %s45_s14  ;;  %s58_s16 = int_to_ptr.vmem [resolvable:$true] %s57_s16 }
  0x1a   :  { %s379_s1 = scalar_lea.vmem %s46_s14, 2048  ;;  %p384_p11 = scmp.lt.s32.totalorder %s46_s14, %s46_s14 }
  0x1b   :  { %p380_p10 = scmp.ne.s32.totalorder %s46_s14, %s379_s1  ;;  %p385_p12 = scmp.lt.s32.totalorder %s379_s1, %s379_s1 }
  0x1d   :  { %p386_p13 = por %p385_p12, %p384_p11 }
  0x1f   :  { %p387_p0 = pnand %p386_p13, %p380_p10 }
  0x21   :  { %390 = shalt.err (!%p387_p0)
}
  0x22   :  { %51 = dma.hbm_to_vmem [thread:$0]  %s527_s2, 2048, %s46_s14, [#allocation6], %s441_s29, %s441_s29, %s442_s30  }
  0x23   :  { %s399_s0 = scalar_lea.vmem %s58_s16, 2048  ;;  %p404_p2 = scmp.lt.s32.totalorder %s58_s16, %s58_s16 }
  0x24   :  { %p400_p1 = scmp.ne.s32.totalorder %s58_s16, %s399_s0  ;;  %p405_p3 = scmp.lt.s32.totalorder %s399_s0, %s399_s0 }
  0x26   :  { %p406_p4 = por %p405_p3, %p404_p2 }
  0x28   :  { %p407_p5 = pnand %p406_p4, %p400_p1 }
  0x2a   :  { %410 = shalt.err (!%p407_p5)
}
  0x2b   :  { %63 = dma.hbm_to_vmem [thread:$0]  %s528_s3, 2048, %s58_s16, [#allocation9], %s441_s29, %s441_s29, %s442_s30  }
  0x2c   :  { %431 = dma.done.wait [#allocation3], 256  }
  0x2d   :  { %432 = vsyncadd [#allocation3], 4294967040 }
  0x2e   :  { %433 = dma.done.wait [#allocation6], 4096  }
  0x2f   :  { %434 = vsyncadd [#allocation6], 4294963200 }
  0x30   :  { %435 = dma.done.wait [#allocation9], 2048  }
  0x31   :  { %436 = vsyncadd [#allocation9], 4294965248  ;;  %v97_v0 = vld [vmem:[#allocation5 + $0x78] sm:$0xff]  ;;  %v96_v4 = vld [vmem:[#allocation5 + $0x70] sm:$0xff]  ;;  %s445_s25 = smov [#allocation10]  }
  0x32   :  { %v113_v1 = vld [vmem:[#allocation7 + $0x78] sm:$0xff]  ;;  %v112_v5 = vld [vmem:[#allocation7 + $0x70] sm:$0xff]  ;;  %v95_v8 = vld [vmem:[#allocation5 + $0x68] sm:$0xff]  ;;  %s257_s26 = sshll.u32 %s445_s25, 4  ;;  %s258_s26 = int_to_ptr.vmem [resolvable:$true] %s257_s26 }
  0x33   :  { %v129_v2 = vld [vmem:[#allocation8 + $0x78] sm:$0xff]  ;;  %v128_v6 = vld [vmem:[#allocation8 + $0x70] sm:$0xff]  ;;  %v111_v9 = vld [vmem:[#allocation7 + $0x68] sm:$0xff]  ;;  %p416_p7 = scmp.lt.s32.totalorder %s258_s26, %s258_s26 }
  0x34   :  { %v145_v3 = vmul.f32 %v129_v2, %v113_v1  ;;  %v144_v7 = vmul.f32 %v128_v6, %v112_v5  ;;  %v127_v10 = vld [vmem:[#allocation8 + $0x68] sm:$0xff]  ;;  %v110_v13 = vld [vmem:[#allocation7 + $0x60] sm:$0xff]  ;;  %v109_v18 = vld [vmem:[#allocation7 + $0x58] sm:$0xff] }
  0x35   :  { %v143_v12 = vmul.f32 %v127_v10, %v111_v9  ;;  %v126_v14 = vld [vmem:[#allocation8 + $0x60] sm:$0xff]  ;;  %v125_v19 = vld [vmem:[#allocation8 + $0x58] sm:$0xff]  ;;  %v108_v22 = vld [vmem:[#allocation7 + $0x50] sm:$0xff] }
  0x36   :  { %v161_v11 = vadd.f32 %v145_v3, %v97_v0  ;;  %v160_v15 = vadd.f32 %v144_v7, %v96_v4  ;;  %v94_v16 = vld [vmem:[#allocation5 + $0x60] sm:$0xff]  ;;  %v142_v17 = vmul.f32 %v126_v14, %v110_v13  ;;  %v141_v21 = vmul.f32 %v125_v19, %v109_v18  ;;  %v124_v23 = vld [vmem:[#allocation8 + $0x50] sm:$0xff]  ;;  %v93_v24 = vld [vmem:[#allocation5 + $0x58] sm:$0xff] }
  0x37   :  { %v159_v20 = vadd.f32 %v143_v12, %v95_v8  ;;  %v107_v25 = vld [vmem:[#allocation7 + $0x48] sm:$0xff]  ;;  %v140_v28 = vmul.f32 %v124_v23, %v108_v22  ;;  %v92_v29 = vld [vmem:[#allocation5 + $0x50] sm:$0xff]  ;;  %v106_v30 = vld [vmem:[#allocation7 + $0x40] sm:$0xff]  ;;  %v170_v18 = vlaneseq }
  0x38   :  { %289 = vmatprep.subr.mxu0 %v161_v11  ;;  %v123_v26 = vld [vmem:[#allocation8 + $0x48] sm:$0xff]  ;;  %v158_v27 = vadd.f32 %v142_v17, %v94_v16  ;;  %v122_v31 = vld [vmem:[#allocation8 + $0x40] sm:$0xff]  ;;  %v157_v32 = vadd.f32 %v141_v21, %v93_v24  ;;  %v105_v35 = vld [vmem:[#allocation7 + $0x38] sm:$0xff] }
  0x39   :  { %290 = vmatpush3.msra.mxu0 %v161_v11  ;;  %v139_v33 = vmul.f32 %v123_v26, %v107_v25  ;;  %v91_v34 = vld [vmem:[#allocation5 + $0x48] sm:$0xff]  ;;  %v121_v36 = vld [vmem:[#allocation8 + $0x38] sm:$0xff]  ;;  %v156_v37 = vadd.f32 %v140_v28, %v92_v29  ;;  %v138_v38 = vmul.f32 %v122_v31, %v106_v30  ;;  %v90_v39 = vld [vmem:[#allocation5 + $0x40] sm:$0xff]  ;;  %v171_v22 = vshrl.u32 %v170_v18, 7 }
  0x3a   :  { %291 = vmatprep.subr.mxu0 %v160_v15  ;;  %v104_v40 = vld [vmem:[#allocation7 + $0x30] sm:$0xff]  ;;  %v137_v43 = vmul.f32 %v121_v36, %v105_v35  ;;  %v89_v44 = vld [vmem:[#allocation5 + $0x38] sm:$0xff]  ;;  %v103_v45 = vld [vmem:[#allocation7 + $0x28] sm:$0xff] }
  0x3b   :  { %292 = vmatpush3.msra.mxu0 %v160_v15  ;;  %v120_v41 = vld [vmem:[#allocation8 + $0x30] sm:$0xff]  ;;  %v155_v42 = vadd.f32 %v139_v33, %v91_v34  ;;  %v119_v46 = vld [vmem:[#allocation8 + $0x28] sm:$0xff]  ;;  %v154_v47 = vadd.f32 %v138_v38, %v90_v39  ;;  %v102_v50 = vld [vmem:[#allocation7 + $0x20] sm:$0xff]  ;;  %v172_v25 = vsub.s32 0, %v171_v22 }
  0x3c   :  { %293 = vmatprep.subr.mxu0 %v159_v20  ;;  %v88_v48 = vld [vmem:[#allocation5 + $0x30] sm:$0xff]  ;;  %v136_v49 = vmul.f32 %v120_v41, %v104_v40  ;;  %v118_v51 = vld [vmem:[#allocation8 + $0x20] sm:$0xff]  ;;  %v153_v53 = vadd.f32 %v137_v43, %v89_v44  ;;  %v135_v54 = vmul.f32 %v119_v46, %v103_v45  ;;  %v87_v55 = vld [vmem:[#allocation5 + $0x28] sm:$0xff] }
  0x3d   :  { %294 = vmatpush3.msra.mxu0 %v159_v20  ;;  %v167_v52 = vld [vmem:[#allocation2] sm:$0xff]  ;;  %v101_v56 = vld [vmem:[#allocation7 + $0x18] sm:$0xff]  ;;  %v134_v59 = vmul.f32 %v118_v51, %v102_v50  ;;  %v86_v60 = vld [vmem:[#allocation5 + $0x20] sm:$0xff] }
  0x3e   :  { %295 = vmatprep.subr.mxu0 %v158_v27  ;;  %321 = vmatprep.mubr.f32.mxu0 %v167_v52  ;;  %v117_v57 = vld [vmem:[#allocation8 + $0x18] sm:$0xff]  ;;  %v152_v58 = vadd.f32 %v136_v49, %v88_v48  ;;  %v100_v61 = vld [vmem:[#allocation7 + $0x10] sm:$0xff]  ;;  %v151_v63 = vadd.f32 %v135_v54, %v87_v55  ;;  %v99_v2 = vld [vmem:[#allocation7 + $0x8] sm:$0xff] }
  0x3f   :  { %296 = vmatpush3.msra.mxu0 %v158_v27  ;;  %v116_v62 = vld [vmem:[#allocation8 + $0x10] sm:$0xff]  ;;  %v133_v0 = vmul.f32 %v117_v57, %v101_v56  ;;  %v85_v1 = vld [vmem:[#allocation5 + $0x18] sm:$0xff]  ;;  %v115_v3 = vld [vmem:[#allocation8 + $0x8] sm:$0xff]  ;;  %v150_v4 = vadd.f32 %v134_v59, %v86_v60 }
  0x40   :  { %297 = vmatprep.subr.mxu0 %v157_v32  ;;  %v132_v5 = vmul.f32 %v116_v62, %v100_v61  ;;  %v84_v6 = vld [vmem:[#allocation5 + $0x10] sm:$0xff]  ;;  %v98_v7 = vld [vmem:[#allocation7] sm:$0xff]  ;;  %v131_v10 = vmul.f32 %v115_v3, %v99_v2  ;;  %v83_v11 = vld [vmem:[#allocation5 + $0x8] sm:$0xff] }
  0x41   :  { %298 = vmatpush3.msra.mxu0 %v157_v32  ;;  %v114_v8 = vld [vmem:[#allocation8] sm:$0xff]  ;;  %v149_v9 = vadd.f32 %v133_v0, %v85_v1  ;;  %v168_v17 = vld [vmem:[#allocation2 + $0x8] sm:$0xff]  ;;  %v163_v19 = vld [vmem:[%s530_s5] sm:$0x1]  ;;  %s411_s5 = scalar_lea.vmem %s258_s26, 256 }
  0x42   :  { %299 = vmatprep.subr.mxu0 %v156_v37  ;;  %v148_v12 = vadd.f32 %v132_v5, %v84_v6  ;;  %v130_v13 = vmul.f32 %v114_v8, %v98_v7  ;;  %v82_v14 = vld [vmem:[#allocation5] sm:$0xff]  ;;  %v147_v15 = vadd.f32 %v131_v10, %v83_v11  ;;  %v164_v20 = vld [vmem:[%s531_s6] sm:$0x1]  ;;  %p412_p6 = scmp.ne.s32.totalorder %s258_s26, %s411_s5  ;;  %p417_p8 = scmp.lt.s32.totalorder %s411_s5, %s411_s5 }
  0x43   :  { %300 = vmatpush3.msra.mxu0 %v156_v37  ;;  %v165_v21 = vmul.f32 %v164_v20, %v163_v19  ;;  %v162_v23 = vld [vmem:[%s529_s4] sm:$0x1] }
  0x44   :  { %301 = vmatprep.subr.mxu0 %v155_v42  ;;  %v146_v16 = vadd.f32 %v130_v13, %v82_v14  ;;  %p418_p9 = por %p417_p8, %p416_p7 }
  0x45   :  { %302 = vmatpush3.msra.mxu0 %v155_v42  ;;  %v166_v24 = vadd.f32 %v165_v21, %v162_v23 }
  0x46   :  { %303 = vmatprep.subr.mxu0 %v154_v47  ;;  %p419_p10 = pnand %p418_p9, %p412_p6 }
  0x47   :  { %304 = vmatpush3.msra.mxu0 %v154_v47  ;;  %v173_v26 = vrot.slane %v166_v24, %v172_v25 }
  0x48   :  { %305 = vmatprep.subr.mxu0 %v153_v53 }
  0x49   :  { %306 = vmatpush3.msra.mxu0 %v153_v53 }
  0x4a   :  { %307 = vmatprep.subr.mxu0 %v152_v58 }
  0x4b   :  { %308 = vmatpush3.msra.mxu0 %v152_v58 }
  0x4c   :  { %309 = vmatprep.subr.mxu0 %v151_v63 }
  0x4d   :  { %310 = vmatpush3.msra.mxu0 %v151_v63 }
  0x4e   :  { %311 = vmatprep.subr.mxu0 %v150_v4 }
  0x4f   :  { %312 = vmatpush3.msra.mxu0 %v150_v4 }
  0x50   :  { %313 = vmatprep.subr.mxu0 %v149_v9 }
  0x51   :  { %314 = vmatpush3.msra.mxu0 %v149_v9 }
  0x52   :  { %315 = vmatprep.subr.mxu0 %v148_v12 }
  0x53   :  { %316 = vmatpush3.msra.mxu0 %v148_v12 }
  0x54   :  { %317 = vmatprep.subr.mxu0 %v147_v15 }
  0x55   :  { %318 = vmatpush3.msra.mxu0 %v147_v15 }
  0x56   :  { %319 = vmatprep.subr.mxu0 %v146_v16 }
  0x57   :  { %320 = vmatpush3.msra.mxu0 %v146_v16 }
  0x58   :  { %322 = vmatmul.mubr.f32.vlgmr.msra.gmra.mxu0 %v168_v17 }
 0x118   :  { %v323_v27 = vpop.f32.mrf.mxu0 }
 0x119   :  { %v247_v28 = vadd.f32 %v323_v27, %v173_v26 }
 0x11a   :  { %v241_v29 = vpop.f32.mrf.mxu0 }
 0x11b   :  { %251 = vst [vmem:[#allocation10 + $0x8] sm:$0xff] %v247_v28  ;;  %v242_v30 = vadd.f32 %v241_v29, %v173_v26 }
 0x11d   :  { %250 = vst [vmem:[#allocation10] sm:$0xff] %v242_v30 }
 0x11e   :  { %422 = shalt.err (!%p419_p10)
}
 0x11f   :  { %263 = dma.vmem_to_hbm [thread:$0]  %s258_s26, 256, %s532_s7, [#allocation4], %s441_s29, %s441_s29, %s442_s30  }
 0x120   :  { %437 = dma.done.wait [#allocation4], 256  }
 0x121   :  { %438 = vsyncadd [#allocation4], 4294967040 }
 0x122   :  { %267 = vsyncpa [#allocation3], 1 }
 0x123   :  { %268 = vsyncpa [#allocation6], 1 }
 0x124   :  { %269 = vsyncpa [#allocation9], 1 }
 0x125   :  { %270 = vsyncpa [#allocation4], 1 }

</bundles_post_ra>
